<compile_context>
chip_gen: v6e
topology: v6e:2x2x1
jax: 0.10.0
libtpu: 0.0.40
codegen_flags: <defaults>
</compile_context>

<pallas_src>
import functools

import jax
import jax.numpy as jnp
from jax.experimental import pallas as pl
from jax.experimental.pallas import tpu as pltpu

_LANES = 128
_SUBLANES = 8


def _round_up(x, m):
    return (x + m - 1) // m * m


def _loss_partials_kernel(preds_ref, targets_ref, attn_ref, w_ref, out_ref):
    """Per-tile partial sums.

    Writes an (8, 128) f32 block whose row 0 holds:
      lane 0: sum_i weight[target_i] * nll_i     (CE numerator)
      lane 1: sum_i weight[target_i]             (CE denominator)
      lane 2: sum_i var(softmax(attn_i))         (regularizer numerator)
    Everything else is zero; the wrapper reduces across blocks.
    """
    preds = preds_ref[...].astype(jnp.float32)     # (T, C) logits
    targets = targets_ref[...]                     # (T, 1) int32 (-1 == padding row)
    attn = attn_ref[...].astype(jnp.float32)       # (T, S) attention logits
    w_col = w_ref[...].astype(jnp.float32)         # (C, 1) per-class weights

    t, c = preds.shape
    s = attn.shape[-1]

    ones_c = jnp.ones((c, 1), jnp.float32)
    ones_s = jnp.ones((s, 1), jnp.float32)

    # ---- weighted cross entropy partials -----------------------------------
    m = jnp.max(preds, axis=-1, keepdims=True)                        # (T, 1)
    e = jnp.exp(preds - m)                                            # (T, C)
    # row reductions as ones-matvecs -> MXU (keeps XLU/VALU slots free)
    sumexp = jnp.dot(e, ones_c, preferred_element_type=jnp.float32)   # (T, 1)
    lse = m + jnp.log(sumexp)                                         # (T, 1)

    class_ids = jax.lax.broadcasted_iota(jnp.int32, (t, c), 1)        # (T, C)
    onehot = (class_ids == targets).astype(jnp.float32)               # (T, C)

    tgt_logit = jnp.dot(onehot * preds, ones_c,
                        preferred_element_type=jnp.float32)           # (T, 1)
    wt = jnp.dot(onehot, w_col, preferred_element_type=jnp.float32)   # (T, 1)

    nll = lse - tgt_logit                                             # (T, 1)
    wt_nll_sum = jnp.sum(wt * nll)                                    # scalar
    wt_sum = jnp.sum(wt)                                              # scalar

    # ---- diversity regularizer partial --------------------------------------
    am = jnp.max(attn, axis=-1, keepdims=True)                        # (T, 1)
    ea = jnp.exp(attn - am)                                           # (T, S)
    denom = jnp.dot(ea, ones_s, preferred_element_type=jnp.float32)   # (T, 1)
    p = ea / denom                                                    # (T, S)
    sum_p = jnp.dot(p, ones_s, preferred_element_type=jnp.float32)    # (T, 1)
    sum_p2 = jnp.dot(p * p, ones_s, preferred_element_type=jnp.float32)
    inv_s = jnp.float32(1.0 / s)
    var = sum_p2 * inv_s - (sum_p * inv_s) ** 2                       # E[p^2]-(E[p])^2
    var = jnp.maximum(var, 0.0)                                       # clamp cancellation
    var_sum = jnp.sum(var)                                            # scalar

    # ---- lane-dense partial-sum output block --------------------------------
    lane = jax.lax.broadcasted_iota(jnp.int32, (_SUBLANES, _LANES), 1)
    sub = jax.lax.broadcasted_iota(jnp.int32, (_SUBLANES, _LANES), 0)
    row = jnp.where(lane == 0, wt_nll_sum,
          jnp.where(lane == 1, wt_sum,
          jnp.where(lane == 2, var_sum, 0.0)))
    out_ref[...] = jnp.where(sub == 0, row, 0.0).astype(jnp.float32)


def diversity_regularized_ce_loss(preds, targets, attention_weights,
                                  weight=None, diversity_lambda=1.0,
                                  tile_n=256):
    """preds: (N, C) float, targets: (N,) int, attention_weights: (N, S) float."""
    n, c = preds.shape
    s = attention_weights.shape[-1]
    if weight is None:
        # CrossEntropyLoss(weight=None) == all-ones class weights.
        weight = jnp.ones((c,), jnp.float32)

    # Batch tile: multiple of 8 (sublane), capped so (tile*(C+S)*4B)*2 buffers
    # stays well under v7x's 64 MiB scoped VMEM for realistic C.
    tile = min(int(tile_n), _round_up(n, _SUBLANES))
    tile = _round_up(tile, _SUBLANES)
    n_pad = _round_up(n, tile)
    num_blocks = n_pad // tile
    pad = n_pad - n

    # NOTE: preds/attn keep their input dtype (e.g. bf16) into the kernel;
    # cast to f32 only inside -> halves HBM traffic for bf16 inputs.
    preds_p = jnp.pad(preds, ((0, pad), (0, 0))) if pad else preds
    attn_p = (jnp.pad(attention_weights, ((0, pad), (0, 0)))
              if pad else attention_weights)
    tgt = targets.astype(jnp.int32)
    tgt_p = jnp.pad(tgt, (0, pad), constant_values=-1) if pad else tgt
    tgt_p = tgt_p.reshape(n_pad, 1)
    w_col = weight.astype(jnp.float32).reshape(c, 1)

    # TODO(synk): for very large class counts (C >~ 16K) add a second grid axis
    # over C with an online logsumexp; here C is kept whole in the lane dim.
    partials = pl.pallas_call(
        _loss_partials_kernel,
        out_shape=jax.ShapeDtypeStruct((num_blocks * _SUBLANES, _LANES),
                                       jnp.float32),
        grid=(num_blocks,),
        in_specs=[
            pl.BlockSpec((tile, c), lambda i: (i, 0)),   # preds
            pl.BlockSpec((tile, 1), lambda i: (i, 0)),   # targets
            pl.BlockSpec((tile, s), lambda i: (i, 0)),   # attention logits
            pl.BlockSpec((c, 1), lambda i: (0, 0)),      # class weights (resident)
        ],
        out_specs=pl.BlockSpec((_SUBLANES, _LANES), lambda i: (i, 0)),
        compiler_params=pltpu.CompilerParams(
            dimension_semantics=("parallel",)),
    )(preds_p, tgt_p, attn_p, w_col)

    totals = jnp.sum(partials, axis=0)                   # (128,)
    ce = totals[0] / totals[1]                           # weighted mean CE
    diversity_reg = -(totals[2] / jnp.float32(n))        # -mean(var)
    return ce + jnp.float32(diversity_lambda) * diversity_reg


def _reference(preds, targets, attn, weight, lam):
    # pure-JAX reference mirroring the PyTorch module
    logp = jax.nn.log_softmax(preds.astype(jnp.float32), axis=-1)
    nll = -jnp.take_along_axis(logp, targets[:, None].astype(jnp.int32),
                               axis=-1)[:, 0]
    wt = weight[targets]
    ce = jnp.sum(wt * nll) / jnp.sum(wt)
    p = jax.nn.softmax(attn.astype(jnp.float32), axis=-1)
    var = jnp.var(p, axis=1)
    return ce + lam * (-jnp.mean(var))


if __name__ == "__main__":
    key = jax.random.PRNGKey(0)

    # --- test 1: small shapes, single grid block -----------------------------
    k1, k2, k3 = jax.random.split(key, 3)
    N, C, S = 8, 32, 64
    preds = jax.random.normal(k1, (N, C), dtype=jnp.float32)
    targets = jax.random.randint(k2, (N,), 0, C, dtype=jnp.int32)
    attention_weights = jax.random.normal(k3, (N, S), dtype=jnp.float32)
    weight = jnp.ones((C,), jnp.float32)
    lam = 1.0

    loss = diversity_regularized_ce_loss(
        preds, targets, attention_weights, weight=weight, diversity_lambda=lam)
    loss = jax.block_until_ready(loss)
    ref = _reference(preds, targets, attention_weights, weight, lam)
    assert jnp.allclose(loss, ref, atol=1e-5, rtol=1e-5), (loss, ref)

    # --- test 2: ragged N, multi-block grid, non-trivial class weights -------
    k4, k5, k6, k7 = jax.random.split(jax.random.PRNGKey(0), 4)
    N2, C2, S2 = 300, 40, 48
    preds2 = jax.random.normal(k4, (N2, C2), dtype=jnp.float32)
    targets2 = jax.random.randint(k5, (N2,), 0, C2, dtype=jnp.int32)
    attn2 = jax.random.normal(k6, (N2, S2), dtype=jnp.float32)
    weight2 = jax.random.uniform(k7, (C2,), jnp.float32, 0.5, 1.5)
    lam2 = 0.3

    loss2 = diversity_regularized_ce_loss(
        preds2, targets2, attn2, weight=weight2, diversity_lambda=lam2,
        tile_n=128)
    loss2 = jax.block_until_ready(loss2)
    ref2 = _reference(preds2, targets2, attn2, weight2, lam2)
    assert jnp.allclose(loss2, ref2, atol=1e-5, rtol=1e-5), (loss2, ref2)

    print("KERNEL_OK")
</pallas_src>

<mosaic_0001>
module attributes {stable_mosaic.version = 11 : i64} {
  func.func @_loss_partials_kernel(%arg0: i32, %arg1: memref<8x32xf32, #tpu.memory_space<vmem>>, %arg2: memref<8x1xi32, #tpu.memory_space<vmem>>, %arg3: memref<8x64xf32, #tpu.memory_space<vmem>>, %arg4: memref<32x1xf32, #tpu.memory_space<vmem>>, %arg5: memref<8x128xf32, #tpu.memory_space<vmem>>) attributes {dimension_semantics = [#tpu.dimension_semantics<parallel>], iteration_bounds = array<i64: 1>, scalar_prefetch = 0 : i64, scratch_operands = 0 : i64, tpu.core_type = #tpu.core_type<tc>, window_params = [{transform_indices = @transform_0, window_bounds = array<i64: 8, 32>}, {transform_indices = @transform_1, window_bounds = array<i64: 8, 1>}, {transform_indices = @transform_2, window_bounds = array<i64: 8, 64>}, {pipeline_mode = #tpu.pipeline_mode<synchronous>, transform_indices = @transform_3, window_bounds = array<i64: 32, 1>}, {transform_indices = @transform_4, window_bounds = array<i64: 8, 128>}]} {
    %c0 = arith.constant 0 : index
    %c0_0 = arith.constant 0 : index
    %0 = vector.load %arg1[%c0, %c0_0] : memref<8x32xf32, #tpu.memory_space<vmem>>, vector<8x32xf32>
    %c0_1 = arith.constant 0 : index
    %c0_2 = arith.constant 0 : index
    %1 = vector.load %arg2[%c0_1, %c0_2] : memref<8x1xi32, #tpu.memory_space<vmem>>, vector<8x1xi32>
    %c0_3 = arith.constant 0 : index
    %c0_4 = arith.constant 0 : index
    %2 = vector.load %arg3[%c0_3, %c0_4] : memref<8x64xf32, #tpu.memory_space<vmem>>, vector<8x64xf32>
    %c0_5 = arith.constant 0 : index
    %c0_6 = arith.constant 0 : index
    %3 = vector.load %arg4[%c0_5, %c0_6] : memref<32x1xf32, #tpu.memory_space<vmem>>, vector<32x1xf32>
    %cst = arith.constant 1.000000e+00 : f32
    %4 = vector.broadcast %cst : f32 to vector<32x1xf32>
    %cst_7 = arith.constant 1.000000e+00 : f32
    %5 = vector.broadcast %cst_7 : f32 to vector<64x1xf32>
    %cst_8 = arith.constant dense<0xFF800000> : vector<8xf32>
    %6 = vector.multi_reduction <maximumf>, %0, %cst_8 [1] : vector<8x32xf32> to vector<8xf32>
    %7 = vector.shape_cast %6 : vector<8xf32> to vector<8x1xf32>
    %8 = vector.broadcast %7 : vector<8x1xf32> to vector<8x32xf32>
    %9 = arith.subf %0, %8 : vector<8x32xf32>
    %10 = math.exp %9 : vector<8x32xf32>
    %cst_9 = arith.constant dense<0.000000e+00> : vector<8x1xf32>
    %11 = tpu.matmul %10, %4, %cst_9 {dimension_numbers = #tpu.dot_dimension_numbers<[1], [0], [0], [1], [0, 0, 1, 1], [], []>} : vector<8x32xf32>, vector<32x1xf32>, vector<8x1xf32> -> vector<8x1xf32>
    %12 = math.log %11 : vector<8x1xf32>
    %13 = arith.addf %7, %12 : vector<8x1xf32>
    %14 = tpu.iota {dimensions = array<i32: 1>} : vector<8x32xi32>
    %15 = vector.broadcast %1 : vector<8x1xi32> to vector<8x32xi32>
    %16 = arith.cmpi eq, %14, %15 : vector<8x32xi32>
    %17 = arith.extui %16 : vector<8x32xi1> to vector<8x32xi32>
    %18 = arith.sitofp %17 : vector<8x32xi32> to vector<8x32xf32>
    %19 = arith.mulf %18, %0 : vector<8x32xf32>
    %cst_10 = arith.constant dense<0.000000e+00> : vector<8x1xf32>
    %20 = tpu.matmul %19, %4, %cst_10 {dimension_numbers = #tpu.dot_dimension_numbers<[1], [0], [0], [1], [0, 0, 1, 1], [], []>} : vector<8x32xf32>, vector<32x1xf32>, vector<8x1xf32> -> vector<8x1xf32>
    %cst_11 = arith.constant dense<0.000000e+00> : vector<8x1xf32>
    %21 = tpu.matmul %18, %3, %cst_11 {dimension_numbers = #tpu.dot_dimension_numbers<[1], [0], [0], [1], [0, 0, 1, 1], [], []>} : vector<8x32xf32>, vector<32x1xf32>, vector<8x1xf32> -> vector<8x1xf32>
    %22 = arith.subf %13, %20 : vector<8x1xf32>
    %23 = arith.mulf %21, %22 : vector<8x1xf32>
    %24 = vector.shape_cast %23 : vector<8x1xf32> to vector<1x8x1xf32>
    %cst_12 = arith.constant dense<0.000000e+00> : vector<1xf32>
    %25 = vector.multi_reduction <add>, %24, %cst_12 [1, 2] : vector<1x8x1xf32> to vector<1xf32>
    %26 = vector.shape_cast %25 : vector<1xf32> to vector<1x1x1xf32>
    %27 = vector.extract %26[0, 0, 0] : f32 from vector<1x1x1xf32>
    %28 = vector.shape_cast %21 : vector<8x1xf32> to vector<1x8x1xf32>
    %cst_13 = arith.constant dense<0.000000e+00> : vector<1xf32>
    %29 = vector.multi_reduction <add>, %28, %cst_13 [1, 2] : vector<1x8x1xf32> to vector<1xf32>
    %30 = vector.shape_cast %29 : vector<1xf32> to vector<1x1x1xf32>
    %31 = vector.extract %30[0, 0, 0] : f32 from vector<1x1x1xf32>
    %cst_14 = arith.constant dense<0xFF800000> : vector<8xf32>
    %32 = vector.multi_reduction <maximumf>, %2, %cst_14 [1] : vector<8x64xf32> to vector<8xf32>
    %33 = vector.shape_cast %32 : vector<8xf32> to vector<8x1xf32>
    %34 = vector.broadcast %33 : vector<8x1xf32> to vector<8x64xf32>
    %35 = arith.subf %2, %34 : vector<8x64xf32>
    %36 = math.exp %35 : vector<8x64xf32>
    %cst_15 = arith.constant dense<0.000000e+00> : vector<8x1xf32>
    %37 = tpu.matmul %36, %5, %cst_15 {dimension_numbers = #tpu.dot_dimension_numbers<[1], [0], [0], [1], [0, 0, 1, 1], [], []>} : vector<8x64xf32>, vector<64x1xf32>, vector<8x1xf32> -> vector<8x1xf32>
    %38 = vector.broadcast %37 : vector<8x1xf32> to vector<8x64xf32>
    %39 = arith.divf %36, %38 : vector<8x64xf32>
    %cst_16 = arith.constant dense<0.000000e+00> : vector<8x1xf32>
    %40 = tpu.matmul %39, %5, %cst_16 {dimension_numbers = #tpu.dot_dimension_numbers<[1], [0], [0], [1], [0, 0, 1, 1], [], []>} : vector<8x64xf32>, vector<64x1xf32>, vector<8x1xf32> -> vector<8x1xf32>
    %41 = arith.mulf %39, %39 : vector<8x64xf32>
    %cst_17 = arith.constant dense<0.000000e+00> : vector<8x1xf32>
    %42 = tpu.matmul %41, %5, %cst_17 {dimension_numbers = #tpu.dot_dimension_numbers<[1], [0], [0], [1], [0, 0, 1, 1], [], []>} : vector<8x64xf32>, vector<64x1xf32>, vector<8x1xf32> -> vector<8x1xf32>
    %cst_18 = arith.constant 1.562500e-02 : f32
    %43 = vector.broadcast %cst_18 : f32 to vector<8x1xf32>
    %44 = arith.mulf %42, %43 : vector<8x1xf32>
    %cst_19 = arith.constant 1.562500e-02 : f32
    %45 = vector.broadcast %cst_19 : f32 to vector<8x1xf32>
    %46 = arith.mulf %40, %45 : vector<8x1xf32>
    %47 = arith.mulf %46, %46 : vector<8x1xf32>
    %48 = arith.subf %44, %47 : vector<8x1xf32>
    %cst_20 = arith.constant 0.000000e+00 : f32
    %49 = vector.broadcast %cst_20 : f32 to vector<8x1xf32>
    %50 = arith.maximumf %48, %49 : vector<8x1xf32>
    %51 = vector.shape_cast %50 : vector<8x1xf32> to vector<1x8x1xf32>
    %cst_21 = arith.constant dense<0.000000e+00> : vector<1xf32>
    %52 = vector.multi_reduction <add>, %51, %cst_21 [1, 2] : vector<1x8x1xf32> to vector<1xf32>
    %53 = vector.shape_cast %52 : vector<1xf32> to vector<1x1x1xf32>
    %54 = vector.extract %53[0, 0, 0] : f32 from vector<1x1x1xf32>
    %55 = tpu.iota {dimensions = array<i32: 1>} : vector<8x128xi32>
    %56 = tpu.iota {dimensions = array<i32: 0>} : vector<8x128xi32>
    %c0_i32 = arith.constant 0 : i32
    %57 = vector.broadcast %c0_i32 : i32 to vector<8x128xi32>
    %58 = arith.cmpi eq, %55, %57 : vector<8x128xi32>
    %c1_i32 = arith.constant 1 : i32
    %59 = vector.broadcast %c1_i32 : i32 to vector<8x128xi32>
    %60 = arith.cmpi eq, %55, %59 : vector<8x128xi32>
    %c2_i32 = arith.constant 2 : i32
    %61 = vector.broadcast %c2_i32 : i32 to vector<8x128xi32>
    %62 = arith.cmpi eq, %55, %61 : vector<8x128xi32>
    %cst_22 = arith.constant 0.000000e+00 : f32
    %63 = vector.broadcast %54 : f32 to vector<8x128xf32>
    %64 = vector.broadcast %cst_22 : f32 to vector<8x128xf32>
    %65 = arith.select %62, %63, %64 : vector<8x128xi1>, vector<8x128xf32>
    %66 = vector.broadcast %31 : f32 to vector<8x128xf32>
    %67 = arith.select %60, %66, %65 : vector<8x128xi1>, vector<8x128xf32>
    %68 = vector.broadcast %27 : f32 to vector<8x128xf32>
    %69 = arith.select %58, %68, %67 : vector<8x128xi1>, vector<8x128xf32>
    %c0_i32_23 = arith.constant 0 : i32
    %70 = vector.broadcast %c0_i32_23 : i32 to vector<8x128xi32>
    %71 = arith.cmpi eq, %56, %70 : vector<8x128xi32>
    %cst_24 = arith.constant 0.000000e+00 : f32
    %72 = vector.broadcast %cst_24 : f32 to vector<8x128xf32>
    %73 = arith.select %71, %69, %72 : vector<8x128xi1>, vector<8x128xf32>
    %c0_25 = arith.constant 0 : index
    %c0_26 = arith.constant 0 : index
    %74 = vector.load %arg5[%c0_25, %c0_26] : memref<8x128xf32, #tpu.memory_space<vmem>>, vector<8x128xf32>
    tpu.vector_store %arg5[%c0_25, %c0_26], %73 {strides = array<i32>} : memref<8x128xf32, #tpu.memory_space<vmem>>, vector<8x128xf32>,
    return
  }
  func.func @transform_0(%arg0: i32) -> (i32, i32) {
    %c0_i32 = arith.constant 0 : i32
    %c0_i32_0 = arith.constant 0 : i32
    return %arg0, %c0_i32 : i32, i32
  }
  func.func @transform_1(%arg0: i32) -> (i32, i32) {
    %c0_i32 = arith.constant 0 : i32
    %c0_i32_0 = arith.constant 0 : i32
    return %arg0, %c0_i32 : i32, i32
  }
  func.func @transform_2(%arg0: i32) -> (i32, i32) {
    %c0_i32 = arith.constant 0 : i32
    %c0_i32_0 = arith.constant 0 : i32
    return %arg0, %c0_i32 : i32, i32
  }
  func.func @transform_3(%arg0: i32) -> (i32, i32) {
    %c0_i32 = arith.constant 0 : i32
    %c0_i32_0 = arith.constant 0 : i32
    %c0_i32_1 = arith.constant 0 : i32
    return %c0_i32, %c0_i32_0 : i32, i32
  }
  func.func @transform_4(%arg0: i32) -> (i32, i32) {
    %c0_i32 = arith.constant 0 : i32
    %c0_i32_0 = arith.constant 0 : i32
    return %arg0, %c0_i32 : i32, i32
  }
}

</mosaic_0001>

<bundles_post_ra>
// kernel: tpu_custom_call.1
= control target key start
LH: loop header
LB: loop body
LE: loop exit
PB: predicated region body
PF: predicated region fallthrough
CT: control target
= control target key end

     0   :  { %vm286_vm0 = vcmask 523264   ;;  %vm25_vm1 = vcmask 261120   ;;  %v745_v4 = vmov 0   ;;  %s903_s0 = inlined_call_operand.vmem [shape: f32[8,32], index: 0, kind: input, shape index: {}]   ;;  %s904_s1 = inlined_call_operand.vmem [shape: s32[8,1], index: 1, kind: input, shape index: {}]   ;;  %s905_s2 = inlined_call_operand.vmem [shape: f32[8,64], index: 2, kind: input, shape index: {}]   ;;  %s906_s3 = inlined_call_operand.vmem [shape: f32[32,1], index: 3, kind: input, shape index: {}]   ;;  %s907_s4 = inlined_call_operand.hbm [shape: f32[8,128], index: 4, kind: output, shape index: {}]  }
   0x1   :  { %v20_v0 = vld [vmem:[%s905_s2] sm:$0xff]  ;;  %713 = vset.pattern.permute.xlu0 %v745_v4  ;;  %714 = vset.pattern.permute.xlu1 %v745_v4 }
   0x2   :  { %v18_v1 = vld [vmem:[%s903_s0] sm:$0xff]  ;;  %v287_v2 = vsel %vm286_vm0, %v20_v0, -inf }
   0x3   :  { %v26_v3 = vsel %vm25_vm1, %v18_v1, -inf }
   0x4   :  { %9 = vsyncpa [#allocation3], 0  ;;  %288 = vmax.xlane.f32.xlu0 %v287_v2  ;;  %27 = vmax.xlane.f32.xlu1 %v26_v3  ;;  %v746_v5 = vmov 0.0   ;;  %v747_v6 = vmov 1.0   ;;  %v19_v7 = vld [vmem:[%s904_s1] sm:$0xff]  ;;  %vm748_vm2 = vmmov 0   ;;  %v108_v10 = vlaneseq }
   0x5   :  { %623 = vmatprep.subr.mxu1 %v746_v5  ;;  %612 = vmatprep.subr.mxu0 %v746_v5  ;;  %v24_v19 = vld [vmem:[%s906_s3 + $0x18] sm:$0xff]  ;;  %v23_v21 = vld [vmem:[%s906_s3 + $0x10] sm:$0xff]  ;;  %v22_v22 = vld [vmem:[%s906_s3 + $0x8] sm:$0xff]  ;;  %vm265_vm4 = vcmask 7168   ;;  %s749_s28 = smov [#allocation2]  }
   0x6   :  { %624 = vmatpush3.msra.mxu1 %v747_v6  ;;  %613 = vmatpush3.msra.mxu0 %v747_v6  ;;  %v812_v13 = vand.u32 127, %v108_v10  ;;  %v21_v23 = vld [vmem:[%s906_s3] sm:$0xff]  ;;  %s555_s29 = sshll.u32 %s749_s28, 4  ;;  %s556_s29 = int_to_ptr.vmem [resolvable:$true] %s555_s29 }
   0x7   :  { %625 = vmatprep.subr.mxu1 %v746_v5  ;;  %614 = vmatprep.subr.mxu0 %v746_v5  ;;  %s723_s30 = scalar_lea.vmem %s556_s29, 128  ;;  %p728_p1 = scmp.lt.s32.totalorder %s556_s29, %s556_s29 }
   0x8   :  { %626 = vmatpush3.msra.mxu1 %v747_v6  ;;  %615 = vmatpush3.msra.mxu0 %v747_v6  ;;  %vm539_vm5 = vcmp.eq.s32.totalorder %v812_v13, 2  ;;  %vm538_vm6 = vcmp.eq.s32.totalorder %v812_v13, 1  ;;  %vm537_vm7 = vcmp.eq.s32.totalorder %v812_v13, 0  ;;  %p724_p0 = scmp.ne.s32.totalorder %s556_s29, %s723_s30  ;;  %p729_p2 = scmp.lt.s32.totalorder %s723_s30, %s723_s30 }
   0x9   :  { %627 = vmatprep.subr.mxu1 %v746_v5  ;;  %616 = vmatprep.subr.mxu0 %v746_v5 }
   0xa   :  { %628 = vmatpush3.msra.mxu1 %v747_v6  ;;  %617 = vmatpush3.msra.mxu0 %v747_v6  ;;  %p730_p3 = por %p729_p2, %p728_p1 }
   0xb   :  { %629 = vmatprep.subr.mxu1 %v746_v5  ;;  %618 = vmatprep.subr.mxu0 %v746_v5 }
   0xc   :  { %630 = vmatpush3.msra.mxu1 %v747_v6  ;;  %631 = vmatprep.mubr.msk.f32.mxu1 %vm748_vm2, %v746_v5  ;;  %p731_p4 = pnand %p730_p3, %p724_p0 }
   0xd   :  { %645 = vmatprep.subr.mxu1 %v746_v5  ;;  %619 = vmatpush3.msra.mxu0 %v747_v6 }
   0xe   :  { %620 = vmatprep.mubr.msk.f32.mxu0 %vm748_vm2, %v746_v5  ;;  %634 = vmatprep.subr.mxu0 %v746_v5 }
  0x1a   :  { %111 = vperm.xlu0 %713, %v19_v7  }
  0x8d   :  { %v808_v8 = vpop.xlane.xlu1 %27  ;;  %v289_v12 = vpop.xlane.xlu0 %288 }
  0x8e   :  { %v29_v9 = vsub.f32 %v18_v1, %v808_v8  ;;  %v290_v14 = vsub.f32 %v20_v0, %v289_v12  ;;  %v536_v12 = vshrl.u32 %v108_v10, 7 }
  0x90   :  { %v30_v11 = vmul.f32 1.442695, %v29_v9  ;;  %v291_v18 = vmul.f32 1.442695, %v290_v14  ;;  %vm546_vm8 = vcmp.eq.s32.totalorder %v536_v12, 0 }
  0x92   :  { %715 = vpow2.f32 %v30_v11 }
  0x93   :  { %717 = vpow2.f32 %v291_v18 }
  0x95   :  { %v112_v15 = vpop.permute.xlu0 %111 }
  0x96   :  { %vm113_vm3 = vcmp.eq.s32.totalorder %v812_v13, %v112_v15 }
  0x97   :  { %v564_v16 = vsel %vm113_vm3, 1.0, %v746_v5 }
  0x98   :  { %v116_v17 = vmul.f32 %v564_v16, %v18_v1 }
  0x9a   :  { %632 = vmatmul.mubr.msk.f32.vlgmr.msra.gmra.mxu1 %vm25_vm1, %v116_v17 }
  0x9b   :  { %646 = vmatpush3.msra.mxu1 %v747_v6  ;;  %661 = vmatprep.mubr.msk.f32.mxu1 %vm748_vm2, %v746_v5 }
  0x9c   :  { %647 = vmatprep.subr.mxu1 %v746_v5 }
  0x9d   :  { %648 = vmatpush3.msra.mxu1 %v747_v6 }
  0x9e   :  { %649 = vmatprep.subr.mxu1 %v746_v5 }
  0x9f   :  { %650 = vmatpush3.msra.mxu1 %v747_v6  ;;  %v716_v20 = vpop.eup %715 }
  0xa0   :  { %651 = vmatprep.subr.mxu1 %v746_v5  ;;  %621 = vmatmul.mubr.msk.f32.vlgmr.msra.gmra.mxu0 %vm25_vm1, %v716_v20  ;;  %v718_v24 = vpop.eup %717 }
  0xa1   :  { %652 = vmatpush3.msra.mxu1 %v747_v6  ;;  %635 = vmatpush3.msra.mxu0 %v24_v19 }
  0xa2   :  { %653 = vmatprep.subr.mxu1 %v746_v5  ;;  %636 = vmatprep.subr.mxu0 %v746_v5 }
  0xa3   :  { %654 = vmatpush3.msra.mxu1 %v747_v6  ;;  %637 = vmatpush3.msra.mxu0 %v23_v21 }
  0xa4   :  { %655 = vmatprep.subr.mxu1 %v746_v5  ;;  %638 = vmatprep.subr.mxu0 %v746_v5 }
  0xa5   :  { %656 = vmatpush3.msra.mxu1 %v747_v6  ;;  %639 = vmatpush3.msra.mxu0 %v22_v22 }
  0xa6   :  { %657 = vmatprep.subr.mxu1 %v746_v5  ;;  %640 = vmatprep.subr.mxu0 %v746_v5 }
  0xa7   :  { %642 = vmatprep.mubr.msk.f32.mxu0 %vm748_vm2, %v746_v5  ;;  %641 = vmatpush3.msra.mxu0 %v21_v23 }
  0xa8   :  { %658 = vmatpush3.msra.mxu1 %v747_v6  ;;  %643 = vmatmul.mubr.msk.f32.vlgmr.msra.gmra.mxu0 %vm25_vm1, %v564_v16 }
  0xa9   :  { %659 = vmatprep.subr.mxu1 %v746_v5  ;;  %664 = vmatprep.subr.mxu0 %v746_v5 }
  0xaa   :  { %660 = vmatpush3.msra.mxu1 %v747_v6  ;;  %665 = vmatpush3.msra.mxu0 %v747_v6 }
  0xab   :  { %662 = vmatmul.mubr.msk.f32.vlgmr.msra.gmra.mxu1 %vm286_vm0, %v718_v24  ;;  %666 = vmatprep.subr.mxu0 %v746_v5 }
  0xac   :  { %683 = vmatprep.subr.mxu1 %v746_v5  ;;  %667 = vmatpush3.msra.mxu0 %v747_v6 }
  0xad   :  { %684 = vmatpush3.msra.mxu1 %v747_v6  ;;  %668 = vmatprep.subr.mxu0 %v746_v5 }
  0xae   :  { %685 = vmatprep.subr.mxu1 %v746_v5  ;;  %669 = vmatpush3.msra.mxu0 %v747_v6 }
  0xaf   :  { %686 = vmatpush3.msra.mxu1 %v747_v6  ;;  %670 = vmatprep.subr.mxu0 %v746_v5 }
  0xb0   :  { %687 = vmatprep.subr.mxu1 %v746_v5  ;;  %671 = vmatpush3.msra.mxu0 %v747_v6 }
  0xb1   :  { %688 = vmatpush3.msra.mxu1 %v747_v6  ;;  %672 = vmatprep.subr.mxu0 %v746_v5 }
  0xb2   :  { %689 = vmatprep.subr.mxu1 %v746_v5  ;;  %673 = vmatpush3.msra.mxu0 %v747_v6 }
  0xb3   :  { %690 = vmatpush3.msra.mxu1 %v747_v6  ;;  %674 = vmatprep.subr.mxu0 %v746_v5 }
  0xb4   :  { %691 = vmatprep.subr.mxu1 %v746_v5  ;;  %675 = vmatpush3.msra.mxu0 %v747_v6 }
  0xb5   :  { %692 = vmatpush3.msra.mxu1 %v747_v6  ;;  %676 = vmatprep.subr.mxu0 %v746_v5 }
  0xb6   :  { %693 = vmatprep.subr.mxu1 %v746_v5  ;;  %677 = vmatpush3.msra.mxu0 %v747_v6 }
  0xb7   :  { %694 = vmatpush3.msra.mxu1 %v747_v6  ;;  %678 = vmatprep.subr.mxu0 %v746_v5 }
  0xb8   :  { %695 = vmatprep.subr.mxu1 %v746_v5  ;;  %679 = vmatpush3.msra.mxu0 %v747_v6 }
  0xb9   :  { %680 = vmatprep.mubr.msk.f32.mxu0 %vm748_vm2, %v746_v5  ;;  %696 = vmatpush3.msra.mxu1 %v747_v6 }
  0xba   :  { %699 = vmatprep.mubr.msk.f32.mxu1 %vm748_vm2, %v746_v5  ;;  %697 = vmatprep.subr.mxu1 %v746_v5 }
  0xbb   :  { %698 = vmatpush3.msra.mxu1 %v747_v6 }
 0x15a   :  { %v186_v25 = vpop.f32.mrf.mxu1 }
 0x15c   :  { %v633_v26 = vpop.f32.mrf.mxu1 }
 0x160   :  { %v101_v27 = vpop.f32.mrf.mxu0 }
 0x161   :  { %719 = vlog2.f32 %v101_v27 }
 0x162   :  { %v622_v28 = vpop.f32.mrf.mxu0 }
 0x168   :  { %v259_v29 = vpop.f32.mrf.mxu0 }
 0x169   :  { %v276_v30 = vsel %vm265_vm4, %v259_v29, 0.0 }
 0x16a   :  { %277 = vadd.xlane.f32.xlu0 %v276_v30  ;;  %v644_v32 = vpop.f32.mrf.mxu0 }
 0x16b   :  { %v362_v31 = vpop.f32.mrf.mxu1 }
 0x16c   :  { %368 = vperm.xlu1 %714, %v362_v31  }
 0x16d   :  { %v663_v33 = vpop.f32.mrf.mxu1 }
 0x16e   :  { %v720_v34 = vpop.eup %719 }
 0x16f   :  { %v106_v35 = vmul.f32 0.6931472, %v720_v34 }
 0x171   :  { %v107_v36 = vadd.f32 %v106_v35, %v808_v8 }
 0x173   :  { %v263_v37 = vsub.f32 %v107_v36, %v186_v25 }
 0x175   :  { %v264_v38 = vmul.f32 %v263_v37, %v259_v29 }
 0x177   :  { %v266_v39 = vsel %vm265_vm4, %v264_v38, 0.0 }
 0x190   :  { %267 = vadd.xlane.f32.xlu1 %v266_v39 }
 0x1e7   :  { %v369_v40 = vpop.permute.xlu1 %368 }
 0x1e8   :  { %721 = vrcp.f32 %v369_v40 }
 0x1f3   :  { %v278_v44 = vpop.xlane.xlu0 %277 }
 0x1f4   :  { %v279_v45 = vrot.slane %v278_v44, 4 }
 0x1f5   :  { %v722_v41 = vpop.eup %721 }
 0x1f6   :  { %v372_v42 = vmul.f32 %v722_v41, %v718_v24  ;;  %v280_v46 = vadd.f32 %v279_v45, %v278_v44 }
 0x1f8   :  { %681 = vmatmul.mubr.msk.f32.vlgmr.msra.gmra.mxu0 %vm286_vm0, %v372_v42  ;;  %v446_v43 = vmul.f32 %v372_v42, %v372_v42  ;;  %v281_v47 = vrot.slane %v280_v46, 2 }
 0x1fa   :  { %700 = vmatmul.mubr.msk.f32.vlgmr.msra.gmra.mxu1 %vm286_vm0, %v446_v43  ;;  %v282_v51 = vadd.f32 %v281_v47, %v280_v46 }
 0x1fc   :  { %v283_v54 = vrot.slane %v282_v51, 1 }
 0x1fe   :  { %v284_v57 = vadd.f32 %v283_v54, %v282_v51 }
 0x219   :  { %v268_v48 = vpop.xlane.xlu1 %267 }
 0x21a   :  { %v269_v49 = vrot.slane %v268_v48, 4 }
 0x21c   :  { %v270_v50 = vadd.f32 %v269_v49, %v268_v48 }
 0x21e   :  { %v271_v52 = vrot.slane %v270_v50, 2 }
 0x220   :  { %v272_v53 = vadd.f32 %v271_v52, %v270_v50 }
 0x222   :  { %v273_v55 = vrot.slane %v272_v53, 1 }
 0x224   :  { %v274_v56 = vadd.f32 %v273_v55, %v272_v53 }
 0x226   :  { %702 = vpush %v274_v56 }
 0x227   :  { %704 = vpush %v284_v57 }
 0x257   :  { %s703_s3 = spop %702 }
 0x258   :  { %s705_s26 = spop %704  ;;  %v544_v17 = vstv %s703_s3 }
 0x259   :  { %v542_v15 = vstv %s705_s26 }
 0x2b8   :  { %v442_v58 = vpop.f32.mrf.mxu0 }
 0x2b9   :  { %v521_v59 = vmul.f32 0.015625, %v442_v58 }
 0x2ba   :  { %v682_v60 = vpop.f32.mrf.mxu0  ;;  %v516_v61 = vpop.f32.mrf.mxu1 }
 0x2bb   :  { %v522_v62 = vmul.f32 %v521_v59, %v521_v59  ;;  %v520_v63 = vmul.f32 0.015625, %v516_v61 }
 0x2bc   :  { %v701_v0 = vpop.f32.mrf.mxu1 }
 0x2bd   :  { %v523_v1 = vsub.f32 %v520_v63, %v522_v62 }
 0x2bf   :  { %v524_v2 = vmax.f32 %v523_v1, 0.0 }
 0x2c1   :  { %v525_v3 = vsel %vm265_vm4, %v524_v2, 0.0 }
 0x2c2   :  { %526 = vadd.xlane.f32.xlu1 %v525_v3 }
 0x34b   :  { %v527_v4 = vpop.xlane.xlu1 %526 }
 0x34c   :  { %v528_v5 = vrot.slane %v527_v4, 4 }
 0x34e   :  { %v529_v6 = vadd.f32 %v528_v5, %v527_v4 }
 0x350   :  { %v530_v7 = vrot.slane %v529_v6, 2 }
 0x352   :  { %v531_v8 = vadd.f32 %v530_v7, %v529_v6 }
 0x354   :  { %v532_v9 = vrot.slane %v531_v8, 1 }
 0x356   :  { %v533_v11 = vadd.f32 %v532_v9, %v531_v8 }
 0x358   :  { %706 = vpush %v533_v11 }
 0x389   :  { %s707_s27 = spop %706 }
 0x38a   :  { %v540_v14 = vstv %s707_s27 }
 0x38b   :  { %v541_v16 = vsel %vm539_vm5, %v540_v14, 0.0 }
 0x38c   :  { %v543_v18 = vsel %vm538_vm6, %v542_v15, %v541_v16 }
 0x38d   :  { %v545_v19 = vsel %vm537_vm7, %v544_v17, %v543_v18 }
 0x38e   :  { %v547_v20 = vsel %vm546_vm8, %v545_v19, 0.0 }
 0x38f   :  { %548 = vst [vmem:[#allocation2] sm:$0xff] %v547_v20 }
 0x390   :  { %734 = shalt.err (!%p731_p4)
}
 0x391   :  { %558 = dma.vmem_to_hbm [thread:$0]  %s556_s29, 128, %s907_s4, [#allocation3]  }
 0x392   :  { %743 = dma.done.wait [#allocation3], 128  }
 0x393   :  { %744 = vsyncadd [#allocation3], 4294967168 }
 0x394   :  { %562 = vsyncpa [#allocation3], 1 }

</bundles_post_ra>
